<compile_context>
chip_gen: v5e
topology: v5e:2x2
jax: 0.10.0
libtpu: 0.0.40
codegen_flags: <defaults>
</compile_context>

<pallas_src>
import functools
import math

import jax
import jax.numpy as jnp
from jax.experimental import pallas as pl
from jax.experimental.pallas import tpu as pltpu


def _round_up(a, m):
    return ((a + m - 1) // m) * m


def make_dct_basis_T(N, dtype=jnp.float32):
    """DCT-II basis, transposed: DT[n, k] = 2*cos(pi*(2n+1)*k/(2N))."""
    n = jnp.arange(N, dtype=jnp.float32)[:, None]
    k = jnp.arange(N, dtype=jnp.float32)[None, :]
    return (2.0 * jnp.cos(math.pi * (2.0 * n + 1.0) * k / (2.0 * N))).astype(dtype)


def _feca_kernel(inv_l, x_ref, w1_ref, w2_ref, gamma_ref, beta_ref, o_ref):
    x = x_ref[...]                                            # (TM, L) f32

    # --- DCT-II folded into fc1 (W1p = D^T @ W1); bf16 MXU operands, f32 acc ---
    h = jnp.dot(x.astype(jnp.bfloat16), w1_ref[...],
                preferred_element_type=jnp.float32)           # (TM, HP)
    # TODO(synk): Dropout(p=0.1) treated as inference-mode identity.
    h = jnp.maximum(h, 0.0)

    # --- Linear(2L -> L, no bias) -> Sigmoid (padded hidden rows of W2 are 0) ---
    logits = jnp.dot(h.astype(jnp.bfloat16), w2_ref[...],
                     preferred_element_type=jnp.float32)      # (TM, L)
    s = jax.nn.sigmoid(logits)

    # --- LayerNorm over L (eps=1e-6, biased var, affine); no lane padding so
    #     no masking — single-pass E[s^2]-mean^2 in f32 (s in [0,1], stable) ---
    mean = jnp.sum(s, axis=-1, keepdims=True) * inv_l
    ex2 = jnp.sum(s * s, axis=-1, keepdims=True) * inv_l
    var = ex2 - mean * mean
    scale = gamma_ref[...] * jax.lax.rsqrt(var + 1e-6)        # fused affine scale
    lr_weight = (s - mean) * scale + beta_ref[...]            # (TM, L)

    # --- channel-frequency re-weighting ---
    o_ref[...] = (x * lr_weight).astype(o_ref.dtype)


def _choose_row_tile(rows, max_tile=2048, min_steps=4):
    """Pick the row tile for the flattened (B*C, L) activation.

    Tiny problems: a single grid step (the ~0.35 us/step overhead dominates a
    ~100 KiB problem).  Large problems: the biggest tile (<= max_tile) that
    still leaves >= min_steps grid steps so the step-(i+1) input DMA overlaps
    step-i compute/writeback and both v7x TensorCores get work under
    dimension_semantics=("parallel",).
    """
    if rows <= 1024:
        return _round_up(rows, 8)
    tm = min(max_tile, (rows // min_steps) // 8 * 8)
    return max(8, tm)


def prepare_feca_params(dct_T, w1, w2, gamma, beta):
    """One-time weight preparation (hoisted out of the per-call path).

    Folds the DCT basis into fc1 (exact — no nonlinearity between them),
    zero-pads the hidden dim H -> multiple of 128 (exact: ReLU(0)=0 and the
    matching W2 rows are zero), and casts MXU operands to bf16.
    """
    f32 = jnp.float32
    hi = jax.lax.Precision.HIGHEST
    L, H = w1.shape
    HP = _round_up(H, 128)

    w1p = jnp.dot(dct_T.astype(f32), w1.astype(f32), precision=hi)          # (L, H)
    w1p_pad = jnp.zeros((L, HP), f32).at[:, :H].set(w1p).astype(jnp.bfloat16)
    w2_pad = jnp.zeros((HP, L), f32).at[:H, :].set(w2.astype(f32)).astype(jnp.bfloat16)
    gamma2 = gamma.reshape(1, L).astype(f32)
    beta2 = beta.reshape(1, L).astype(f32)
    return w1p_pad, w2_pad, gamma2, beta2


@functools.partial(jax.jit, static_argnames=("max_row_tile", "min_grid_steps"))
def feca_dct_channel_block(x, w1p_pad, w2_pad, gamma2, beta2,
                           *, max_row_tile=2048, min_grid_steps=4):
    """Forward pass.  Takes weights already prepared by prepare_feca_params."""
    B, C, L = x.shape
    HP = w1p_pad.shape[1]
    R = B * C
    tm = _choose_row_tile(R, max_row_tile, min_grid_steps)
    grid = (pl.cdiv(R, tm),)

    # Free reshape (contiguous); no host-side pad/crop — block last dim is the
    # full L extent (exempt from the 128-lane rule), tail row-block (if any) is
    # a partial block handled by Pallas (per-row math, so garbage tail rows
    # never influence valid rows and their writes are dropped).
    x2 = x.reshape(R, L)

    out = pl.pallas_call(
        functools.partial(_feca_kernel, 1.0 / float(L)),
        out_shape=jax.ShapeDtypeStruct((R, L), x.dtype),
        grid_spec=pltpu.PrefetchScalarGridSpec(
            num_scalar_prefetch=0,
            grid=grid,
            in_specs=[
                pl.BlockSpec((tm, L), lambda i: (i, 0)),    # x rows (f32)
                pl.BlockSpec((L, HP), lambda i: (0, 0)),    # folded fc1 (bf16, resident)
                pl.BlockSpec((HP, L), lambda i: (0, 0)),    # fc2 (bf16, resident)
                pl.BlockSpec((1, L), lambda i: (0, 0)),     # LayerNorm gamma
                pl.BlockSpec((1, L), lambda i: (0, 0)),     # LayerNorm beta
            ],
            out_specs=pl.BlockSpec((tm, L), lambda i: (i, 0)),
        ),
        compiler_params=pltpu.CompilerParams(dimension_semantics=("parallel",)),
    )(x2, w1p_pad, w2_pad, gamma2, beta2)

    return out.reshape(B, C, L)


def _reference_matched(x, w1p_pad, w2_pad, gamma2, beta2):
    """Pure-JAX reference mirroring the kernel's numerics (folded DCT, padded
    hidden dim, bf16 MXU operands, f32 accumulation/elementwise)."""
    h = jnp.einsum("bcl,lh->bch", x.astype(jnp.bfloat16), w1p_pad,
                   preferred_element_type=jnp.float32)
    h = jnp.maximum(h, 0.0)
    logits = jnp.einsum("bch,hl->bcl", h.astype(jnp.bfloat16), w2_pad,
                        preferred_element_type=jnp.float32)
    s = jax.nn.sigmoid(logits)
    mean = jnp.mean(s, axis=-1, keepdims=True)
    var = jnp.mean(jnp.square(s - mean), axis=-1, keepdims=True)
    lr = (s - mean) * jax.lax.rsqrt(var + 1e-6) * gamma2[0] + beta2[0]
    return x * lr


def _reference_f32(x, dct_T, w1, w2, gamma, beta):
    """Full-f32 reference of the original module forward (semantic check)."""
    hi = jax.lax.Precision.HIGHEST
    f = jnp.einsum("bcl,lk->bck", x, dct_T, precision=hi)          # DCT-II, *2
    h = jnp.maximum(jnp.einsum("bck,kh->bch", f, w1, precision=hi), 0.0)
    s = jax.nn.sigmoid(jnp.einsum("bch,hl->bcl", h, w2, precision=hi))
    mean = jnp.mean(s, axis=-1, keepdims=True)
    var = jnp.mean(jnp.square(s - mean), axis=-1, keepdims=True)
    lr = (s - mean) * jax.lax.rsqrt(var + 1e-6) * gamma.reshape(1, 1, -1) \
        + beta.reshape(1, 1, -1)
    return x * lr


if __name__ == "__main__":
    # Module constraints: fc operates on the length axis and LayerNorm is [96],
    # so the forward only type-checks when the length (= constructor channel) is 96.
    B, C, L = 2, 8, 96

    key = jax.random.PRNGKey(0)
    kx, kw1, kw2 = jax.random.split(key, 3)

    x = jax.random.normal(kx, (B, C, L), dtype=jnp.float32)

    # Deterministic PyTorch-Linear-like init, stored (in_features, out_features).
    bound1 = 1.0 / math.sqrt(L)
    w1 = jax.random.uniform(kw1, (L, 2 * L), jnp.float32, -bound1, bound1)
    bound2 = 1.0 / math.sqrt(2 * L)
    w2 = jax.random.uniform(kw2, (2 * L, L), jnp.float32, -bound2, bound2)

    # LayerNorm affine params (PyTorch defaults: ones / zeros).
    gamma = jnp.ones((L,), dtype=jnp.float32)
    beta = jnp.zeros((L,), dtype=jnp.float32)

    dct_T = make_dct_basis_T(L)

    # One-time weight preparation (not part of the per-call path).
    w1p_pad, w2_pad, gamma2, beta2 = prepare_feca_params(dct_T, w1, w2, gamma, beta)

    out = feca_dct_channel_block(x, w1p_pad, w2_pad, gamma2, beta2)
    out = jax.block_until_ready(out)
    assert out.shape == (B, C, L)

    # Correctness vs. a matched-precision pure-JAX reference (tight tolerance).
    ref = _reference_matched(x, w1p_pad, w2_pad, gamma2, beta2)
    assert jnp.allclose(out, ref, atol=2e-3, rtol=2e-3)

    # Semantic check vs. the full-f32 module forward (loose tolerance: bf16 MXU
    # operands deviate ~1e-3 relative from true f32 numerics).
    ref32 = _reference_f32(x, dct_T, w1, w2, gamma, beta)
    assert jnp.allclose(out, ref32, atol=0.15, rtol=0.05)

    print("KERNEL_OK")
</pallas_src>

<mosaic_0001>
module attributes {stable_mosaic.version = 11 : i64} {
  func.func @_feca_kernel(%arg0: i32, %arg1: memref<16x96xf32, #tpu.memory_space<vmem>>, %arg2: memref<96x256xbf16, #tpu.memory_space<vmem>>, %arg3: memref<256x96xbf16, #tpu.memory_space<vmem>>, %arg4: memref<1x96xf32, #tpu.memory_space<vmem>>, %arg5: memref<1x96xf32, #tpu.memory_space<vmem>>, %arg6: memref<16x96xf32, #tpu.memory_space<vmem>>) attributes {dimension_semantics = [#tpu.dimension_semantics<parallel>], iteration_bounds = array<i64: 1>, scalar_prefetch = 0 : i64, scratch_operands = 0 : i64, tpu.core_type = #tpu.core_type<tc>, window_params = [{transform_indices = @transform_0, window_bounds = array<i64: 16, 96>}, {pipeline_mode = #tpu.pipeline_mode<synchronous>, transform_indices = @transform_1, window_bounds = array<i64: 96, 256>}, {pipeline_mode = #tpu.pipeline_mode<synchronous>, transform_indices = @transform_2, window_bounds = array<i64: 256, 96>}, {pipeline_mode = #tpu.pipeline_mode<synchronous>, transform_indices = @transform_3, window_bounds = array<i64: 1, 96>}, {pipeline_mode = #tpu.pipeline_mode<synchronous>, transform_indices = @transform_4, window_bounds = array<i64: 1, 96>}, {transform_indices = @transform_5, window_bounds = array<i64: 16, 96>}]} {
    %c0 = arith.constant 0 : index
    %c0_0 = arith.constant 0 : index
    %0 = vector.load %arg1[%c0, %c0_0] : memref<16x96xf32, #tpu.memory_space<vmem>>, vector<16x96xf32>
    %1 = arith.truncf %0 : vector<16x96xf32> to vector<16x96xbf16>
    %c0_1 = arith.constant 0 : index
    %c0_2 = arith.constant 0 : index
    %2 = vector.load %arg2[%c0_1, %c0_2] : memref<96x256xbf16, #tpu.memory_space<vmem>>, vector<96x256xbf16>
    %cst = arith.constant dense<0.000000e+00> : vector<16x256xf32>
    %3 = tpu.matmul %1, %2, %cst {dimension_numbers = #tpu.dot_dimension_numbers<[1], [0], [0], [1], [0, 0, 1, 1], [], []>} : vector<16x96xbf16>, vector<96x256xbf16>, vector<16x256xf32> -> vector<16x256xf32>
    %cst_3 = arith.constant 0.000000e+00 : f32
    %4 = vector.broadcast %cst_3 : f32 to vector<16x256xf32>
    %5 = arith.maximumf %3, %4 : vector<16x256xf32>
    %6 = arith.truncf %5 : vector<16x256xf32> to vector<16x256xbf16>
    %c0_4 = arith.constant 0 : index
    %c0_5 = arith.constant 0 : index
    %7 = vector.load %arg3[%c0_4, %c0_5] : memref<256x96xbf16, #tpu.memory_space<vmem>>, vector<256x96xbf16>
    %cst_6 = arith.constant dense<0.000000e+00> : vector<16x96xf32>
    %8 = tpu.matmul %6, %7, %cst_6 {dimension_numbers = #tpu.dot_dimension_numbers<[1], [0], [0], [1], [0, 0, 1, 1], [], []>} : vector<16x256xbf16>, vector<256x96xbf16>, vector<16x96xf32> -> vector<16x96xf32>
    %9 = arith.negf %8 : vector<16x96xf32>
    %10 = math.exp %9 : vector<16x96xf32>
    %cst_7 = arith.constant 1.000000e+00 : f32
    %11 = vector.broadcast %cst_7 : f32 to vector<16x96xf32>
    %12 = arith.addf %11, %10 : vector<16x96xf32>
    %13 = arith.divf %11, %12 : vector<16x96xf32>
    %cst_8 = arith.constant dense<0.000000e+00> : vector<16xf32>
    %14 = vector.multi_reduction <add>, %13, %cst_8 [1] : vector<16x96xf32> to vector<16xf32>
    %15 = vector.shape_cast %14 : vector<16xf32> to vector<16x1xf32>
    %cst_9 = arith.constant 0.010416667 : f32
    %16 = vector.broadcast %cst_9 : f32 to vector<16x1xf32>
    %17 = arith.mulf %15, %16 : vector<16x1xf32>
    %18 = arith.mulf %13, %13 : vector<16x96xf32>
    %cst_10 = arith.constant dense<0.000000e+00> : vector<16xf32>
    %19 = vector.multi_reduction <add>, %18, %cst_10 [1] : vector<16x96xf32> to vector<16xf32>
    %20 = vector.shape_cast %19 : vector<16xf32> to vector<16x1xf32>
    %cst_11 = arith.constant 0.010416667 : f32
    %21 = vector.broadcast %cst_11 : f32 to vector<16x1xf32>
    %22 = arith.mulf %20, %21 : vector<16x1xf32>
    %23 = arith.mulf %17, %17 : vector<16x1xf32>
    %24 = arith.subf %22, %23 : vector<16x1xf32>
    %c0_12 = arith.constant 0 : index
    %c0_13 = arith.constant 0 : index
    %25 = vector.load %arg4[%c0_12, %c0_13] : memref<1x96xf32, #tpu.memory_space<vmem>>, vector<1x96xf32>
    %cst_14 = arith.constant 9.99999997E-7 : f32
    %26 = vector.broadcast %cst_14 : f32 to vector<16x1xf32>
    %27 = arith.addf %24, %26 : vector<16x1xf32>
    %28 = math.rsqrt %27 : vector<16x1xf32>
    %29 = vector.broadcast %25 : vector<1x96xf32> to vector<16x96xf32>
    %30 = vector.broadcast %28 : vector<16x1xf32> to vector<16x96xf32>
    %31 = arith.mulf %29, %30 : vector<16x96xf32>
    %32 = vector.broadcast %17 : vector<16x1xf32> to vector<16x96xf32>
    %33 = arith.subf %13, %32 : vector<16x96xf32>
    %34 = arith.mulf %33, %31 : vector<16x96xf32>
    %c0_15 = arith.constant 0 : index
    %c0_16 = arith.constant 0 : index
    %35 = vector.load %arg5[%c0_15, %c0_16] : memref<1x96xf32, #tpu.memory_space<vmem>>, vector<1x96xf32>
    %36 = vector.broadcast %35 : vector<1x96xf32> to vector<16x96xf32>
    %37 = arith.addf %34, %36 : vector<16x96xf32>
    %38 = arith.mulf %0, %37 : vector<16x96xf32>
    %c0_17 = arith.constant 0 : index
    %c0_18 = arith.constant 0 : index
    %39 = vector.load %arg6[%c0_17, %c0_18] : memref<16x96xf32, #tpu.memory_space<vmem>>, vector<16x96xf32>
    tpu.vector_store %arg6[%c0_17, %c0_18], %38 {strides = array<i32>} : memref<16x96xf32, #tpu.memory_space<vmem>>, vector<16x96xf32>,
    return
  }
  func.func @transform_0(%arg0: i32) -> (i32, i32) {
    %c0_i32 = arith.constant 0 : i32
    %c0_i32_0 = arith.constant 0 : i32
    return %arg0, %c0_i32 : i32, i32
  }
  func.func @transform_1(%arg0: i32) -> (i32, i32) {
    %c0_i32 = arith.constant 0 : i32
    %c0_i32_0 = arith.constant 0 : i32
    %c0_i32_1 = arith.constant 0 : i32
    return %c0_i32, %c0_i32_0 : i32, i32
  }
  func.func @transform_2(%arg0: i32) -> (i32, i32) {
    %c0_i32 = arith.constant 0 : i32
    %c0_i32_0 = arith.constant 0 : i32
    %c0_i32_1 = arith.constant 0 : i32
    return %c0_i32, %c0_i32_0 : i32, i32
  }
  func.func @transform_3(%arg0: i32) -> (i32, i32) {
    %c0_i32 = arith.constant 0 : i32
    %c0_i32_0 = arith.constant 0 : i32
    %c0_i32_1 = arith.constant 0 : i32
    return %c0_i32, %c0_i32_0 : i32, i32
  }
  func.func @transform_4(%arg0: i32) -> (i32, i32) {
    %c0_i32 = arith.constant 0 : i32
    %c0_i32_0 = arith.constant 0 : i32
    %c0_i32_1 = arith.constant 0 : i32
    return %c0_i32, %c0_i32_0 : i32, i32
  }
  func.func @transform_5(%arg0: i32) -> (i32, i32) {
    %c0_i32 = arith.constant 0 : i32
    %c0_i32_0 = arith.constant 0 : i32
    return %arg0, %c0_i32 : i32, i32
  }
}

</mosaic_0001>

<bundles_post_ra>
// kernel: feca_dct_channel_block.1
= control target key start
LH: loop header
LB: loop body
LE: loop exit
PB: predicated region body
PF: predicated region fallthrough
CT: control target
= control target key end

     0   :  { %s782_s0 = inlined_call_operand.vmem [shape: f32[16,96], index: 0, kind: input, shape index: {}]   ;;  %s783_s1 = inlined_call_operand.vmem [shape: bf16[96,256], index: 1, kind: input, shape index: {}]   ;;  %s784_s2 = inlined_call_operand.vmem [shape: bf16[256,96], index: 2, kind: input, shape index: {}]   ;;  %s785_s3 = inlined_call_operand.vmem [shape: f32[1,96], index: 3, kind: input, shape index: {}]   ;;  %s786_s4 = inlined_call_operand.vmem [shape: f32[1,96], index: 4, kind: input, shape index: {}]   ;;  %s787_s5 = inlined_call_operand.hbm [shape: f32[16,96], index: 5, kind: output, shape index: {}]  }
   0x1   :  { %v453_v0 = vld [vmem:[%s783_s1 + $0x50] sm:$0xf]  ;;  %v538_v1 = vld [vmem:[%s783_s1 + $0x54] sm:$0xf0]  ;;  %v537_v2 = vld [vmem:[%s783_s1 + $0x54] sm:$0xf] }
   0x2   :  { %v454_v3 = vor.u32 %v538_v1, %v453_v0  ;;  %v455_v4 = vld [vmem:[%s783_s1 + $0x58] sm:$0xf0]  ;;  %v445_v5 = vld [vmem:[%s783_s1 + $0x40] sm:$0xf]  ;;  %v536_v6 = vld [vmem:[%s783_s1 + $0x44] sm:$0xf0] }
   0x3   :  { %v458_v7 = vor.u32 %v537_v2, %v455_v4  ;;  %v535_v8 = vld [vmem:[%s783_s1 + $0x44] sm:$0xf]  ;;  %v447_v9 = vld [vmem:[%s783_s1 + $0x48] sm:$0xf0]  ;;  %v446_v10 = vor.u32 %v536_v6, %v445_v5  ;;  %v437_v12 = vld [vmem:[%s783_s1 + $0x30] sm:$0xf] }
   0x4   :  { %103 = vmatpush.bf16.msra.mxu0 %v454_v3  ;;  %v450_v11 = vor.u32 %v535_v8, %v447_v9  ;;  %v534_v13 = vld [vmem:[%s783_s1 + $0x34] sm:$0xf0]  ;;  %v533_v14 = vld [vmem:[%s783_s1 + $0x34] sm:$0xf]  ;;  %v439_v15 = vld [vmem:[%s783_s1 + $0x38] sm:$0xf0] }
   0x5   :  { %117 = vmatpush.bf16.msra.mxu1 %v458_v7  ;;  %v438_v16 = vor.u32 %v534_v13, %v437_v12  ;;  %v442_v17 = vor.u32 %v533_v14, %v439_v15  ;;  %v429_v18 = vld [vmem:[%s783_s1 + $0x20] sm:$0xf]  ;;  %v532_v19 = vld [vmem:[%s783_s1 + $0x24] sm:$0xf0]  ;;  %v546_v20 = vld [vmem:[%s784_s2 + $0x38] sm:$0xff] }
   0x6   :  { %v531_v21 = vld [vmem:[%s783_s1 + $0x24] sm:$0xf]  ;;  %v431_v22 = vld [vmem:[%s783_s1 + $0x28] sm:$0xf0]  ;;  %v554_v23 = vld [vmem:[%s784_s2 + $0x78] sm:$0xff]  ;;  %263 = vmatpush.bf16.msra.mxu2 %v546_v20  ;;  %v430_v25 = vor.u32 %v532_v19, %v429_v18 }
   0x7   :  { %v545_v24 = vld [vmem:[%s784_s2 + $0x30] sm:$0xff]  ;;  %v530_v27 = vld [vmem:[%s783_s1 + $0x14] sm:$0xf0]  ;;  %277 = vmatpush.bf16.msra.mxu3 %v554_v23  ;;  %v434_v29 = vor.u32 %v531_v21, %v431_v22 }
   0x8   :  { %104 = vmatpush.bf16.msra.mxu0 %v446_v10  ;;  %v421_v26 = vld [vmem:[%s783_s1 + $0x10] sm:$0xf] }
   0x9   :  { %118 = vmatpush.bf16.msra.mxu1 %v450_v11  ;;  %v553_v28 = vld [vmem:[%s784_s2 + $0x70] sm:$0xff] }
   0xc   :  { %105 = vmatpush.bf16.msra.mxu0 %v438_v16 }
   0xd   :  { %119 = vmatpush.bf16.msra.mxu1 %v442_v17 }
   0xe   :  { %10 = vsyncpa [#allocation3], 0  ;;  %v529_v30 = vld [vmem:[%s783_s1 + $0x14] sm:$0xf]  ;;  %v423_v31 = vld [vmem:[%s783_s1 + $0x18] sm:$0xf0]  ;;  %264 = vmatpush.bf16.msra.mxu2 %v545_v24  ;;  %v422_v33 = vor.u32 %v530_v27, %v421_v26  ;;  %278 = vmatpush.bf16.msra.mxu3 %v553_v28 }
   0xf   :  { %v544_v32 = vld [vmem:[%s784_s2 + $0x28] sm:$0xff]  ;;  %v426_v35 = vor.u32 %v529_v30, %v423_v31  ;;  %v413_v36 = vld [vmem:[%s783_s1] sm:$0xf]  ;;  %v527_v38 = vld [vmem:[%s783_s1 + $0x4] sm:$0xf]  ;;  %vm97_vm0 = vcmask 785408  }
  0x10   :  { %106 = vmatpush.bf16.msra.mxu0 %v430_v25  ;;  %v552_v34 = vld [vmem:[%s784_s2 + $0x68] sm:$0xff]  ;;  %v543_v40 = vld [vmem:[%s784_s2 + $0x20] sm:$0xff]  ;;  %v542_v47 = vld [vmem:[%s784_s2 + $0x18] sm:$0xff]  ;;  %s399_s30 = sshll.u32 %s787_s5, 4  ;;  %s599_s6 = smov 128   ;;  %s400_s30 = int_to_ptr.hbm [resolvable:$true] %s399_s30 }
  0x11   :  { %120 = vmatpush.bf16.msra.mxu1 %v434_v29  ;;  %v528_v37 = vld [vmem:[%s783_s1 + $0x4] sm:$0xf0]  ;;  %v415_v39 = vld [vmem:[%s783_s1 + $0x8] sm:$0xf0]  ;;  %v727_v42 = vld [vmem:[%s782_s0] sm:$0xff]  ;;  %s600_s7 = smov 8  }
  0x12   :  { %265 = vmatpush.bf16.msra.mxu2 %v544_v32  ;;  %v414_v41 = vor.u32 %v528_v37, %v413_v36  ;;  %v732_v43 = vld [vmem:[%s782_s0 + $0x8] sm:$0xff]  ;;  %279 = vmatpush.bf16.msra.mxu3 %v552_v34  ;;  %v551_v44 = vld [vmem:[%s784_s2 + $0x60] sm:$0xff]  ;;  %v418_v45 = vor.u32 %v527_v38, %v415_v39  ;;  %v550_v48 = vld [vmem:[%s784_s2 + $0x58] sm:$0xff] }
  0x13   :  { %v24_v46 = vpack.c.bf16 %v732_v43, %v727_v42  ;;  %v541_v49 = vld [vmem:[%s784_s2 + $0x10] sm:$0xff]  ;;  %v540_v51 = vld [vmem:[%s784_s2 + $0x8] sm:$0xff]  ;;  %v539_v53 = vld [vmem:[%s784_s2] sm:$0xff] }
  0x14   :  { %107 = vmatpush.bf16.msra.mxu0 %v422_v33  ;;  %v549_v50 = vld [vmem:[%s784_s2 + $0x50] sm:$0xff]  ;;  %v548_v52 = vld [vmem:[%s784_s2 + $0x48] sm:$0xff]  ;;  %v547_v54 = vld [vmem:[%s784_s2 + $0x40] sm:$0xff] }
  0x15   :  { %121 = vmatpush.bf16.msra.mxu1 %v426_v35 }
  0x16   :  { %266 = vmatpush.bf16.msra.mxu2 %v543_v40  ;;  %280 = vmatpush.bf16.msra.mxu3 %v551_v44 }
  0x18   :  { %108 = vmatpush.bf16.msra.mxu0 %v414_v41 }
  0x19   :  { %122 = vmatpush.bf16.msra.mxu1 %v418_v45 }
  0x1a   :  { %267 = vmatpush.bf16.msra.mxu2 %v542_v47  ;;  %281 = vmatpush.bf16.msra.mxu3 %v550_v48 }
  0x1b   :  { %459 = vmatmul.msk.bf16.vlgmr.msra.gmra.mxu0 %vm97_vm0, %v24_v46 }
  0x1c   :  { %460 = vmatmul.msk.bf16.vlgmr.msra.gmra.mxu1 %vm97_vm0, %v24_v46 }
  0x1e   :  { %268 = vmatpush.bf16.msra.mxu2 %v541_v49  ;;  %282 = vmatpush.bf16.msra.mxu3 %v549_v50 }
  0x22   :  { %269 = vmatpush.bf16.msra.mxu2 %v540_v51  ;;  %283 = vmatpush.bf16.msra.mxu3 %v548_v52 }
  0x26   :  { %270 = vmatpush.bf16.msra.mxu2 %v539_v53  ;;  %284 = vmatpush.bf16.msra.mxu3 %v547_v54 }
  0x98   :  { %v110_v55 = vpop.f32.mrf.mxu0 }
  0x99   :  { %v124_v56 = vpop.f32.mrf.mxu1  ;;  %v129_v58 = vmax.f32 %v110_v55, 0.0 }
  0x9a   :  { %v130_v61 = vmax.f32 %v124_v56, 0.0 }
  0xa0   :  { %v112_v57 = vpop.f32.mrf.mxu0 }
  0xa1   :  { %v131_v59 = vmax.f32 %v112_v57, 0.0  ;;  %v126_v60 = vpop.f32.mrf.mxu1 }
  0xa2   :  { %v132_v62 = vmax.f32 %v126_v60, 0.0 }
  0xa3   :  { %v133_v63 = vpack.c.bf16 %v131_v59, %v129_v58 }
  0xa4   :  { %v134_v0 = vpack.c.bf16 %v132_v62, %v130_v61  ;;  %v558_v61 = vld [vmem:[%s785_s3] ss:$0 sm:$0xff]  ;;  %s598_s3 = smov [#allocation2]  }
  0xa5   :  { %271 = vmatmul.bf16.vlgmr.msra.gmra.mxu2 %v133_v63  ;;  %s397_s28 = sshll.u32 %s598_s3, 4  ;;  %s398_s28 = int_to_ptr.vmem [resolvable:$true] %s397_s28 }
  0xa6   :  { %285 = vmatmul.bf16.vlgmr.msra.gmra.mxu3 %v134_v0 }
 0x128   :  { %v272_v1 = vpop.f32.mrf.mxu2 }
 0x129   :  { %v286_v2 = vpop.f32.mrf.mxu3 }
 0x12a   :  { %v287_v3 = vadd.f32 %v286_v2, %v272_v1 }
 0x12c   :  { %v525_v4 = vmul.f32 -1.442695, %v287_v3 }
 0x12e   :  { %560 = vpow2.f32 %v525_v4  ;;  %v559_v4 = vld [vmem:[%s786_s4] ss:$0 sm:$0xff] }
 0x130   :  { %v274_v5 = vpop.f32.mrf.mxu2 }
 0x131   :  { %v288_v6 = vpop.f32.mrf.mxu3 }
 0x132   :  { %v289_v7 = vadd.f32 %v288_v6, %v274_v5 }
 0x134   :  { %v561_v8 = vpop.eup %560  ;;  %v526_v9 = vmul.f32 -1.442695, %v289_v7 }
 0x135   :  { %v297_v10 = vadd.f32 1.0, %v561_v8 }
 0x136   :  { %562 = vpow2.f32 %v526_v9 }
 0x137   :  { %564 = vrcp.f32 %v297_v10  ;;  %v310_v16 = vand.u32 2147483648, %v297_v10  ;;  %v308_v18 = vand.u32 2147483647, %v297_v10  ;;  %vm304_vm2 = vweird.f32 %v297_v10 }
 0x139   :  { %v311_v21 = vor.u32 1.1754944e-38, %v310_v16  ;;  %vm309_vm4 = vcmp.eq.f32.partialorder %v308_v18, 8.507059e+37 }
 0x13c   :  { %v563_v11 = vpop.eup %562 }
 0x13d   :  { %v565_v12 = vpop.eup %564  ;;  %v298_v13 = vadd.f32 1.0, %v563_v11 }
 0x13e   :  { %v300_v14 = vmul.f32 %v565_v12, %v297_v10  ;;  %vm305_vm1 = vweird.f32 %v565_v12 }
 0x13f   :  { %566 = vrcp.f32 %v298_v13  ;;  %vm306_vm3 = vmor %vm304_vm2, %vm305_vm1  ;;  %v325_v28 = vand.u32 2147483648, %v298_v13  ;;  %v323_v31 = vand.u32 2147483647, %v298_v13  ;;  %vm319_vm6 = vweird.f32 %v298_v13 }
 0x140   :  { %v301_v15 = vsub.f32 1.0, %v300_v14 }
 0x141   :  { %v326_v33 = vor.u32 1.1754944e-38, %v325_v28  ;;  %vm324_vm8 = vcmp.eq.f32.partialorder %v323_v31, 8.507059e+37 }
 0x142   :  { %v302_v17 = vmul.f32 %v565_v12, %v301_v15 }
 0x144   :  { %v303_v19 = vadd.f32 %v565_v12, %v302_v17 }
 0x145   :  { %v567_v20 = vpop.eup %566 }
 0x146   :  { %v307_v22 = vsel %vm306_vm3, %v565_v12, %v303_v19  ;;  %v315_v23 = vmul.f32 %v567_v20, %v298_v13  ;;  %vm320_vm5 = vweird.f32 %v567_v20 }
 0x147   :  { %v312_v24 = vsel %vm309_vm4, %v311_v21, %v307_v22  ;;  %vm321_vm7 = vmor %vm319_vm6, %vm320_vm5 }
 0x148   :  { %v329_v25 = vsel %vm97_vm0, %v312_v24, 0.0  ;;  %v337_v26 = vmul.f32 %v312_v24, %v312_v24  ;;  %v316_v27 = vsub.f32 1.0, %v315_v23 }
 0x149   :  { %330 = vadd.xlane.f32.xlu0 %v329_v25 }
 0x14a   :  { %v339_v29 = vsel %vm97_vm0, %v337_v26, 0.0  ;;  %v317_v30 = vmul.f32 %v567_v20, %v316_v27 }
 0x14b   :  { %340 = vadd.xlane.f32.xlu1 %v339_v29 }
 0x14c   :  { %v318_v32 = vadd.f32 %v567_v20, %v317_v30 }
 0x14e   :  { %v322_v34 = vsel %vm321_vm7, %v567_v20, %v318_v32 }
 0x14f   :  { %v327_v35 = vsel %vm324_vm8, %v326_v33, %v322_v34 }
 0x150   :  { %v332_v36 = vsel %vm97_vm0, %v327_v35, 0.0  ;;  %v338_v37 = vmul.f32 %v327_v35, %v327_v35 }
 0x151   :  { %333 = vadd.xlane.f32.xlu0 %v332_v36 }
 0x152   :  { %v342_v38 = vsel %vm97_vm0, %v338_v37, 0.0 }
 0x153   :  { %343 = vadd.xlane.f32.xlu1 %v342_v38 }
 0x1bc   :  { %v331_v39 = vpop.xlane.xlu0 %330 }
 0x1bd   :  { %v335_v40 = vmul.f32 0.010416667, %v331_v39 }
 0x1be   :  { %v341_v41 = vpop.xlane.xlu1 %340 }
 0x1bf   :  { %v347_v44 = vmul.f32 %v335_v40, %v335_v40  ;;  %v345_v45 = vmul.f32 0.010416667, %v341_v41  ;;  %v379_v2 = vsub.f32 %v312_v24, %v335_v40 }
 0x1c1   :  { %v349_v46 = vsub.f32 %v345_v45, %v347_v44 }
 0x1c3   :  { %v352_v47 = vadd.f32 1e-06, %v349_v46 }
 0x1c4   :  { %v334_v48 = vpop.xlane.xlu0 %333 }
 0x1c5   :  { %568 = vrsqrt.f32 %v352_v47  ;;  %v336_v49 = vmul.f32 0.010416667, %v334_v48  ;;  %vm360_vm10 = vweird.f32 %v352_v47 }
 0x1c6   :  { %v344_v50 = vpop.xlane.xlu1 %343 }
 0x1c7   :  { %v348_v51 = vmul.f32 %v336_v49, %v336_v49  ;;  %v346_v52 = vmul.f32 0.010416667, %v344_v50  ;;  %v380_v12 = vsub.f32 %v327_v35, %v336_v49 }
 0x1c9   :  { %v350_v53 = vsub.f32 %v346_v52, %v348_v51 }
 0x1cb   :  { %v569_v54 = vpop.eup %568  ;;  %v353_v55 = vadd.f32 1e-06, %v350_v53 }
 0x1cc   :  { %v355_v56 = vmul.f32 %v569_v54, %v352_v47  ;;  %vm361_vm9 = vweird.f32 %v569_v54 }
 0x1cd   :  { %570 = vrsqrt.f32 %v353_v55  ;;  %vm362_vm11 = vmor %vm360_vm10, %vm361_vm9  ;;  %vm370_vm13 = vweird.f32 %v353_v55 }
 0x1ce   :  { %v356_v57 = vmul.f32 %v569_v54, %v355_v56 }
 0x1d0   :  { %v357_v58 = vmul.f32 0.5, %v356_v57 }
 0x1d2   :  { %v358_v59 = vsub.f32 1.5, %v357_v58 }
 0x1d3   :  { %v571_v60 = vpop.eup %570 }
 0x1d4   :  { %v359_v62 = vmul.f32 %v569_v54, %v358_v59  ;;  %v365_v63 = vmul.f32 %v571_v60, %v353_v55  ;;  %vm371_vm12 = vweird.f32 %v571_v60 }
 0x1d5   :  { %vm372_vm14 = vmor %vm370_vm13, %vm371_vm12 }
 0x1d6   :  { %v363_v0 = vsel %vm362_vm11, %v569_v54, %v359_v62  ;;  %v366_v1 = vmul.f32 %v571_v60, %v365_v63 }
 0x1d7   :  { %v377_v3 = vmul.f32 %v558_v61, %v363_v0 }
 0x1d8   :  { %v367_v5 = vmul.f32 0.5, %v366_v1 }
 0x1d9   :  { %v381_v6 = vmul.f32 %v379_v2, %v377_v3 }
 0x1da   :  { %v368_v7 = vsub.f32 1.5, %v367_v5 }
 0x1db   :  { %v387_v8 = vadd.f32 %v559_v4, %v381_v6 }
 0x1dc   :  { %v369_v9 = vmul.f32 %v571_v60, %v368_v7 }
 0x1dd   :  { %v389_v10 = vmul.f32 %v387_v8, %v727_v42 }
 0x1de   :  { %v373_v11 = vsel %vm372_vm14, %v571_v60, %v369_v9 }
 0x1df   :  { %v378_v13 = vmul.f32 %v558_v61, %v373_v11  ;;  %391 = vst.msk [vmem:[#allocation2] sm:$0xff] %vm97_vm0, %v389_v10 }
 0x1e1   :  { %v382_v14 = vmul.f32 %v380_v12, %v378_v13 }
 0x1e3   :  { %v388_v15 = vadd.f32 %v559_v4, %v382_v14 }
 0x1e5   :  { %v390_v16 = vmul.f32 %v388_v15, %v732_v43 }
 0x1e7   :  { %392 = vst.msk [vmem:[#allocation2 + $0x8] sm:$0xff] %vm97_vm0, %v390_v16 }
 0x1e8   :  { %405 = dma.vmem_to_hbm [thread:$0]  %s398_s28, 256, %s400_s30, [#allocation3], %s599_s6, %s599_s6, %s600_s7  }
 0x1e9   :  { %596 = dma.done.wait [#allocation3], 256  }
 0x1ea   :  { %597 = vsyncadd [#allocation3], 4294967040 }
 0x1eb   :  { %410 = vsyncpa [#allocation3], 1 }

</bundles_post_ra>
